<compile_context>
chip_gen: v5e
topology: v5e:2x2
jax: 0.10.0
libtpu: 0.0.40
codegen_flags: <defaults>
</compile_context>

<pallas_src>
import numpy as np

import jax
import jax.numpy as jnp
from jax.experimental import pallas as pl
from jax.experimental.pallas import tpu as pltpu


# ----------------------------- configuration ------------------------------ #
V = 50          # embed_num  (vocab size)
D = 32          # embed_dim
C = 4           # class_num
Co = 8          # kernel_num (output channels per conv)
Ks = (2, 3, 4)  # kernel_sizes
H = 16          # hidden_size
B = 2           # batch
L = 12          # sequence length

KMAX = max(Ks)
KMIN = min(Ks)
TMAX = L - KMIN + 1            # 11: longest conv output (kernel size 2)
LPAD = TMAX + KMAX - 1         # 14: padded sequence length for the widest window
NCONV = len(Ks)
FEAT = NCONV * Co              # 24: concatenated conv features
OUT_LANES = 128                # lane-dense fused output width (hidden | logit | pad)


# ------------------------------- kernel ----------------------------------- #
def cnn_text_kernel(ids_ref,     # (B*LPAD, 1) int32   padded token ids (-1 = pad)
                    embed_ref,   # (V, D)      f32     embedding table
                    wconv_ref,   # (KMAX*D, FEAT) f32  packed conv weights (zero-padded)
                    bconv_ref,   # (1, FEAT)   f32     packed conv biases
                    mask_ref,    # (TMAX, FEAT) f32    0 / -1e30 per-kernel-size time mask
                    wfc_ref,     # (FEAT, OUT_LANES) f32  fused fc2|fc1 weights (lane-padded)
                    bfc_ref,     # (1, OUT_LANES) f32     fused fc2|fc1 biases
                    out_ref):    # (B, OUT_LANES) f32     hidden in 0:H, logit in H:H+C
    # 1) Embedding gather fused in-kernel as a one-hot matmul on the MXU.
    #    Pad ids (-1) match no vocab entry -> padded rows of x are exactly zero.
    ids = ids_ref[...]                                                  # (B*LPAD, 1)
    onehot = (jax.lax.broadcasted_iota(jnp.int32, (B * LPAD, V), 1)
              == ids).astype(jnp.float32)                               # (B*LPAD, V)
    x = jnp.dot(onehot, embed_ref[...],
                preferred_element_type=jnp.float32)                     # (B*LPAD, D)
    x = x.reshape(B, LPAD, D)

    # 2) All three convs as ONE matmul: im2col with the widest window (KMAX),
    #    contraction dim KMAX*D = 128.
    im2col = jnp.concatenate([x[:, k:k + TMAX, :] for k in range(KMAX)],
                             axis=2)                                    # (B, TMAX, KMAX*D)
    im2col = im2col.reshape(B * TMAX, KMAX * D)
    scores = jnp.dot(im2col, wconv_ref[...],
                     preferred_element_type=jnp.float32)                # (B*TMAX, FEAT)
    scores = scores.reshape(B, TMAX, FEAT)

    # 3) Mask invalid trailing time steps per kernel size, max-over-time pool,
    #    then bias + ReLU (equivalent to bias/ReLU before the pool).
    scores = scores + mask_ref[...][None, :, :]
    pooled = jnp.max(scores, axis=1)                                    # (B, FEAT)
    feats = jnp.maximum(pooled + bconv_ref[...], 0.0)                   # (B, FEAT)

    # TODO(synk): dropout is identity in eval/inference mode; training-mode dropout omitted.

    # 4) Both FC layers fused into one lane-dense matmul + bias.
    out = jnp.dot(feats, wfc_ref[...],
                  preferred_element_type=jnp.float32) + bfc_ref[...]    # (B, OUT_LANES)
    out_ref[...] = out.astype(out_ref.dtype)


# ------------------------------- wrapper ----------------------------------- #
@jax.jit
def cnn_text_forward(token_ids, params):
    """token_ids: (B, L) int32.  Returns (hidden, logit) like the PyTorch module."""
    # Tiny integer layout plumbing only (the actual gather happens in-kernel):
    # pad each sequence to LPAD with -1 (matches no vocab id) and make a column.
    ids_pad = jnp.pad(token_ids.astype(jnp.int32), ((0, 0), (0, LPAD - L)),
                      constant_values=-1)
    ids_col = ids_pad.reshape(B * LPAD, 1)

    vmem = pl.BlockSpec(memory_space=pltpu.MemorySpace.VMEM)

    out = pl.pallas_call(
        cnn_text_kernel,
        out_shape=jax.ShapeDtypeStruct((B, OUT_LANES), jnp.float32),
        in_specs=[vmem] * 7,
        out_specs=vmem,
    )(
        ids_col,
        params['embed'],
        params['conv_w_packed'], params['conv_b_packed'],
        params['time_mask'],
        params['fc_w_packed'], params['fc_b_packed'],
    )

    hidden = out[:, :H]          # (B, H)
    logit = out[:, H:H + C]      # (B, C)
    return hidden, logit


# -------------------------- deterministic params --------------------------- #
def init_params(key):
    keys = jax.random.split(key, 12)
    params = {}

    # nn.Embedding(V, D): N(0, 1)
    params['embed'] = jax.random.normal(keys[0], (V, D), jnp.float32)

    # Conv2d(Ci=1, Co, (K, D)) weights, stored as (K, D, Co), then packed:
    #   rows k*D+d (zero for k >= K), columns j*Co+c (j = conv index in Ks order).
    wconv_cols, bconv_cols = [], []
    for j, K in enumerate(Ks):
        fan_in = 1 * K * D
        bound = 1.0 / float(np.sqrt(fan_in))
        w = jax.random.uniform(keys[1 + 2 * j], (K, D, Co), jnp.float32, -bound, bound)
        b = jax.random.uniform(keys[2 + 2 * j], (1, Co), jnp.float32, -bound, bound)
        w_pad = jnp.pad(w, ((0, KMAX - K), (0, 0), (0, 0)))      # zero rows for k >= K
        wconv_cols.append(w_pad.reshape(KMAX * D, Co))
        bconv_cols.append(b)
    params['conv_w_packed'] = jnp.concatenate(wconv_cols, axis=1)   # (KMAX*D, FEAT)
    params['conv_b_packed'] = jnp.concatenate(bconv_cols, axis=1)   # (1, FEAT)

    # Per-kernel-size validity mask over time positions (0 valid, -1e30 invalid).
    mask = np.zeros((TMAX, FEAT), np.float32)
    for j, K in enumerate(Ks):
        t_valid = L - K + 1
        mask[t_valid:, j * Co:(j + 1) * Co] = -1e30
    params['time_mask'] = jnp.asarray(mask)

    # nn.Linear(FEAT, H) and nn.Linear(FEAT, C), stored pre-transposed and fused
    # into one lane-padded (FEAT, 128) weight: columns 0:H = fc2, H:H+C = fc1.
    bound = 1.0 / float(np.sqrt(FEAT))
    fc1_w = jax.random.uniform(keys[7], (FEAT, C), jnp.float32, -bound, bound)
    fc1_b = jax.random.uniform(keys[8], (1, C), jnp.float32, -bound, bound)
    fc2_w = jax.random.uniform(keys[9], (FEAT, H), jnp.float32, -bound, bound)
    fc2_b = jax.random.uniform(keys[10], (1, H), jnp.float32, -bound, bound)

    fc_w = jnp.zeros((FEAT, OUT_LANES), jnp.float32)
    fc_w = fc_w.at[:, :H].set(fc2_w).at[:, H:H + C].set(fc1_w)
    fc_b = jnp.zeros((1, OUT_LANES), jnp.float32)
    fc_b = fc_b.at[:, :H].set(fc2_b).at[:, H:H + C].set(fc1_b)
    params['fc_w_packed'] = fc_w
    params['fc_b_packed'] = fc_b
    return params


# --------------------------------- main ------------------------------------ #
if __name__ == "__main__":
    key = jax.random.PRNGKey(0)
    pkey, dkey = jax.random.split(key)
    params = init_params(pkey)

    token_ids = jax.random.randint(dkey, (B, L), 0, V, dtype=jnp.int32)

    hidden, logit = cnn_text_forward(token_ids, params)
    jax.block_until_ready((hidden, logit))

    assert hidden.shape == (B, H) and logit.shape == (B, C)
    assert hidden.dtype == jnp.float32 and logit.dtype == jnp.float32
    assert bool(jnp.all(jnp.isfinite(hidden))) and bool(jnp.all(jnp.isfinite(logit)))

    print("KERNEL_OK")
</pallas_src>

<mosaic_0001>
module attributes {stable_mosaic.version = 11 : i64} {
  func.func @cnn_text_kernel(%arg0: memref<28x1xi32, #tpu.memory_space<vmem>>, %arg1: memref<50x32xf32, #tpu.memory_space<vmem>>, %arg2: memref<128x24xf32, #tpu.memory_space<vmem>>, %arg3: memref<1x24xf32, #tpu.memory_space<vmem>>, %arg4: memref<11x24xf32, #tpu.memory_space<vmem>>, %arg5: memref<24x128xf32, #tpu.memory_space<vmem>>, %arg6: memref<1x128xf32, #tpu.memory_space<vmem>>, %arg7: memref<2x128xf32, #tpu.memory_space<vmem>>) attributes {dimension_semantics = [], scalar_prefetch = 0 : i64, scratch_operands = 0 : i64, tpu.core_type = #tpu.core_type<tc>} {
    %c0 = arith.constant 0 : index
    %c0_0 = arith.constant 0 : index
    %0 = vector.load %arg0[%c0, %c0_0] : memref<28x1xi32, #tpu.memory_space<vmem>>, vector<28x1xi32>
    %1 = tpu.iota {dimensions = array<i32: 1>} : vector<28x50xi32>
    %2 = vector.broadcast %0 : vector<28x1xi32> to vector<28x50xi32>
    %3 = arith.cmpi eq, %1, %2 : vector<28x50xi32>
    %4 = arith.extui %3 : vector<28x50xi1> to vector<28x50xi32>
    %5 = arith.sitofp %4 : vector<28x50xi32> to vector<28x50xf32>
    %c0_1 = arith.constant 0 : index
    %c0_2 = arith.constant 0 : index
    %6 = vector.load %arg1[%c0_1, %c0_2] : memref<50x32xf32, #tpu.memory_space<vmem>>, vector<50x32xf32>
    %cst = arith.constant dense<0.000000e+00> : vector<28x32xf32>
    %7 = tpu.matmul %5, %6, %cst {dimension_numbers = #tpu.dot_dimension_numbers<[1], [0], [0], [1], [0, 0, 1, 1], [], []>} : vector<28x50xf32>, vector<50x32xf32>, vector<28x32xf32> -> vector<28x32xf32>
    %8 = vector.shape_cast %7 : vector<28x32xf32> to vector<2x14x32xf32>
    %9 = vector.extract_strided_slice %8 {offsets = [0, 0, 0], sizes = [2, 11, 32], strides = [1, 1, 1]} : vector<2x14x32xf32> to vector<2x11x32xf32>
    %10 = vector.extract_strided_slice %8 {offsets = [0, 1, 0], sizes = [2, 11, 32], strides = [1, 1, 1]} : vector<2x14x32xf32> to vector<2x11x32xf32>
    %11 = vector.extract_strided_slice %8 {offsets = [0, 2, 0], sizes = [2, 11, 32], strides = [1, 1, 1]} : vector<2x14x32xf32> to vector<2x11x32xf32>
    %12 = vector.extract_strided_slice %8 {offsets = [0, 3, 0], sizes = [2, 11, 32], strides = [1, 1, 1]} : vector<2x14x32xf32> to vector<2x11x32xf32>
    %13 = tpu.concatenate %9, %10, %11, %12 in 2 : vector<2x11x32xf32>, vector<2x11x32xf32>, vector<2x11x32xf32>, vector<2x11x32xf32> -> vector<2x11x128xf32>
    %14 = vector.shape_cast %13 : vector<2x11x128xf32> to vector<22x128xf32>
    %c0_3 = arith.constant 0 : index
    %c0_4 = arith.constant 0 : index
    %15 = vector.load %arg2[%c0_3, %c0_4] : memref<128x24xf32, #tpu.memory_space<vmem>>, vector<128x24xf32>
    %cst_5 = arith.constant dense<0.000000e+00> : vector<22x24xf32>
    %16 = tpu.matmul %14, %15, %cst_5 {dimension_numbers = #tpu.dot_dimension_numbers<[1], [0], [0], [1], [0, 0, 1, 1], [], []>} : vector<22x128xf32>, vector<128x24xf32>, vector<22x24xf32> -> vector<22x24xf32>
    %17 = vector.shape_cast %16 : vector<22x24xf32> to vector<2x11x24xf32>
    %c0_6 = arith.constant 0 : index
    %c0_7 = arith.constant 0 : index
    %18 = vector.load %arg4[%c0_6, %c0_7] : memref<11x24xf32, #tpu.memory_space<vmem>>, vector<11x24xf32>
    %19 = vector.shape_cast %18 : vector<11x24xf32> to vector<1x11x24xf32>
    %20 = vector.broadcast %19 : vector<1x11x24xf32> to vector<2x11x24xf32>
    %21 = arith.addf %17, %20 : vector<2x11x24xf32>
    %cst_8 = arith.constant dense<0xFF800000> : vector<2x24xf32>
    %22 = vector.multi_reduction <maximumf>, %21, %cst_8 [1] : vector<2x11x24xf32> to vector<2x24xf32>
    %c0_9 = arith.constant 0 : index
    %c0_10 = arith.constant 0 : index
    %23 = vector.load %arg3[%c0_9, %c0_10] : memref<1x24xf32, #tpu.memory_space<vmem>>, vector<1x24xf32>
    %24 = vector.broadcast %23 : vector<1x24xf32> to vector<2x24xf32>
    %25 = arith.addf %22, %24 : vector<2x24xf32>
    %cst_11 = arith.constant 0.000000e+00 : f32
    %26 = vector.broadcast %cst_11 : f32 to vector<2x24xf32>
    %27 = arith.maximumf %25, %26 : vector<2x24xf32>
    %c0_12 = arith.constant 0 : index
    %c0_13 = arith.constant 0 : index
    %28 = vector.load %arg5[%c0_12, %c0_13] : memref<24x128xf32, #tpu.memory_space<vmem>>, vector<24x128xf32>
    %cst_14 = arith.constant dense<0.000000e+00> : vector<2x128xf32>
    %29 = tpu.matmul %27, %28, %cst_14 {dimension_numbers = #tpu.dot_dimension_numbers<[1], [0], [0], [1], [0, 0, 1, 1], [], []>} : vector<2x24xf32>, vector<24x128xf32>, vector<2x128xf32> -> vector<2x128xf32>
    %c0_15 = arith.constant 0 : index
    %c0_16 = arith.constant 0 : index
    %30 = vector.load %arg6[%c0_15, %c0_16] : memref<1x128xf32, #tpu.memory_space<vmem>>, vector<1x128xf32>
    %31 = vector.broadcast %30 : vector<1x128xf32> to vector<2x128xf32>
    %32 = arith.addf %29, %31 : vector<2x128xf32>
    %c0_17 = arith.constant 0 : index
    %c0_18 = arith.constant 0 : index
    %33 = vector.load %arg7[%c0_17, %c0_18] : memref<2x128xf32, #tpu.memory_space<vmem>>, vector<2x128xf32>
    tpu.vector_store %arg7[%c0_17, %c0_18], %32 {strides = array<i32>} : memref<2x128xf32, #tpu.memory_space<vmem>>, vector<2x128xf32>,
    return
  }
}

</mosaic_0001>

<bundles_post_ra>
// kernel: cnn_text_forward.1
= control target key start
LH: loop header
LB: loop body
LE: loop exit
PB: predicated region body
PF: predicated region fallthrough
CT: control target
= control target key end

     0   :  { %vm76_vm0 = vcmask 1041408   ;;  %v620_v0 = vmov 0   ;;  %v30_v12 = vlaneseq  ;;  %vm63_vm1 = vcmask 408576   ;;  %s624_s23 = smov 96   ;;  %s897_s0 = inlined_call_operand.vmem [shape: s32[28,1], index: 0, kind: input, shape index: {}]   ;;  %s898_s1 = inlined_call_operand.vmem [shape: f32[50,32], index: 1, kind: input, shape index: {}]   ;;  %s899_s2 = inlined_call_operand.vmem [shape: f32[128,24], index: 2, kind: input, shape index: {}]   ;;  %s900_s3 = inlined_call_operand.vmem [shape: f32[1,24], index: 3, kind: input, shape index: {}]   ;;  %s901_s6 = inlined_call_operand.vmem [shape: f32[1,128], index: 6, kind: input, shape index: {}]   ;;  %s902_s4 = inlined_call_operand.vmem [shape: f32[11,24], index: 4, kind: input, shape index: {}]   ;;  %s903_s5 = inlined_call_operand.vmem [shape: f32[24,128], index: 5, kind: input, shape index: {}]   ;;  %s904_s7 = inlined_call_operand.vmem [shape: f32[2,128], index: 7, kind: output, shape index: {}]  }
   0x1   :  { %616 = vset.pattern.permute.xlu0 %v620_v0  ;;  %v26_v1 = vld [vmem:[%s897_s0] sm:$0xff]  ;;  %617 = vset.pattern.permute.xlu1 %v620_v0  ;;  %v28_v2 = vld [vmem:[%s897_s0 + $0x10] sm:$0xff]  ;;  %v61_v4 = vld [vmem:[%s898_s1 + $0x28] sm:$0xff]  ;;  %v621_v15 = vmov 0.0   ;;  %vm169_vm6 = vcmask 1046528   ;;  %vm260_vm7 = vcmask 261120  }
   0x2   :  { %33 = vperm.xlu0 %616, %v26_v1   ;;  %39 = vperm.xlu1 %617, %v28_v2   ;;  %v62_v3 = vld [vmem:[%s898_s1 + $0x30] sm:$0x3]  ;;  %v60_v5 = vld [vmem:[%s898_s1 + $0x20] sm:$0xff]  ;;  %v59_v6 = vld [vmem:[%s898_s1 + $0x18] sm:$0xff]  ;;  %v31_v13 = vand.u32 127, %v30_v12  ;;  %vm265_vm8 = vcmask 523264  }
   0x3   :  { %589 = vmatpush.msk.msra.mxu0 %vm76_vm0, %v62_v3  ;;  %v27_v7 = vld [vmem:[%s897_s0 + $0x8] sm:$0xff]  ;;  %v29_v8 = vld [vmem:[%s897_s0 + $0x18] sm:$0xf]  ;;  %v58_v9 = vld [vmem:[%s898_s1 + $0x10] sm:$0xff]  ;;  %s622_s0 = smov 32   ;;  %vm270_vm9 = vcmask 785408  }
   0x4   :  { %v57_v10 = vld [vmem:[%s898_s1 + $0x8] sm:$0xff]  ;;  %v56_v11 = vld [vmem:[%s898_s1] sm:$0xff]  ;;  %s623_s1 = smov 64   ;;  %v312_v1 = vld [vmem:[%s899_s2 + $0x78] sm:$0xff]  ;;  %vm520_vm10 = vcmask 190464   ;;  %vm518_vm11 = vcmask 195584  }
   0x5   :  { %90 = vmatpush.msra.mxu0 %v61_v4  ;;  %348 = vmatpush.msra.mxu1 %v312_v1  ;;  %v311_v2 = vld [vmem:[%s899_s2 + $0x70] sm:$0xff]  ;;  %v310_v3 = vld [vmem:[%s899_s2 + $0x68] sm:$0xff]  ;;  %v309_v4 = vld [vmem:[%s899_s2 + $0x60] sm:$0xff]  ;;  %vm556_vm12 = vcmask 1041409  }
   0x6   :  { %595 = vmatpush.msra.mxu3 %v312_v1  ;;  %v301_v12 = vld [vmem:[%s899_s2 + $0x20] sm:$0xff] }
   0x7   :  { %91 = vmatpush.msra.mxu0 %v60_v5  ;;  %349 = vmatpush.msra.mxu1 %v311_v2  ;;  %v308_v5 = vld [vmem:[%s899_s2 + $0x58] sm:$0xff] }
   0x8   :  { %596 = vmatpush.msra.mxu3 %v311_v2 }
   0x9   :  { %92 = vmatpush.msra.mxu0 %v59_v6  ;;  %350 = vmatpush.msra.mxu1 %v310_v3  ;;  %v307_v6 = vld [vmem:[%s899_s2 + $0x50] sm:$0xff] }
   0xa   :  { %36 = vperm.xlu0 %616, %v27_v7   ;;  %42 = vperm.xlu1 %617, %v29_v8   ;;  %v306_v7 = vld [vmem:[%s899_s2 + $0x48] sm:$0xff]  ;;  %v305_v8 = vld [vmem:[%s899_s2 + $0x40] sm:$0xff] }
   0xb   :  { %93 = vmatpush.msra.mxu0 %v58_v9  ;;  %597 = vmatpush.msra.mxu3 %v310_v3  ;;  %v304_v9 = vld [vmem:[%s899_s2 + $0x38] sm:$0xff] }
   0xc   :  { %351 = vmatpush.msra.mxu1 %v309_v4 }
   0xd   :  { %94 = vmatpush.msra.mxu0 %v57_v10  ;;  %598 = vmatpush.msra.mxu3 %v309_v4  ;;  %v303_v10 = vld [vmem:[%s899_s2 + $0x30] sm:$0xff] }
   0xe   :  { %352 = vmatpush.msra.mxu1 %v308_v5 }
   0xf   :  { %95 = vmatpush.msra.mxu0 %v56_v11  ;;  %599 = vmatpush.msra.mxu3 %v308_v5  ;;  %v302_v11 = vld [vmem:[%s899_s2 + $0x28] sm:$0xff] }
  0x10   :  { %353 = vmatpush.msra.mxu1 %v307_v6 }
  0x11   :  { %600 = vmatpush.msra.mxu3 %v307_v6 }
  0x12   :  { %354 = vmatpush.msra.mxu1 %v306_v7 }
  0x13   :  { %601 = vmatpush.msra.mxu3 %v306_v7 }
  0x14   :  { %355 = vmatpush.msra.mxu1 %v305_v8 }
  0x15   :  { %602 = vmatpush.msra.mxu3 %v305_v8 }
  0x16   :  { %356 = vmatpush.msra.mxu1 %v304_v9 }
  0x17   :  { %603 = vmatpush.msra.mxu3 %v304_v9 }
  0x18   :  { %357 = vmatpush.msra.mxu1 %v303_v10 }
  0x19   :  { %604 = vmatpush.msra.mxu3 %v303_v10 }
  0x1a   :  { %358 = vmatpush.msra.mxu1 %v302_v11 }
  0x1b   :  { %605 = vmatpush.msra.mxu3 %v302_v11 }
  0x1c   :  { %359 = vmatpush.msra.mxu1 %v301_v12 }
  0x1d   :  { %606 = vmatpush.msra.mxu3 %v301_v12 }
  0x74   :  { %v34_v14 = vpop.permute.xlu0 %33  ;;  %v40_v18 = vpop.permute.xlu1 %39 }
  0x75   :  { %vm44_vm2 = vcmp.eq.s32.totalorder %v31_v13, %v34_v14  ;;  %vm46_vm4 = vcmp.eq.s32.totalorder %v31_v13, %v40_v18  ;;  %v299_v14 = vld [vmem:[%s899_s2 + $0x10] sm:$0xff]  ;;  %v297_v18 = vld [vmem:[%s899_s2] sm:$0xff] }
  0x76   :  { %v585_v16 = vsel %vm44_vm2, 1.0, %v621_v15  ;;  %v587_v20 = vsel %vm46_vm4, 1.0, %v621_v15 }
  0x77   :  { %590 = vmatmul.msk.f32.vlgmr.msra.gmra.mxu0 %vm63_vm1, %v585_v16  ;;  %v298_v16 = vld [vmem:[%s899_s2 + $0x8] sm:$0xff] }
  0x7c   :  { %v37_v17 = vpop.permute.xlu0 %36  ;;  %v43_v21 = vpop.permute.xlu1 %42 }
  0x7d   :  { %vm45_vm3 = vcmp.eq.s32.totalorder %v31_v13, %v37_v17  ;;  %vm47_vm5 = vcmp.eq.s32.totalorder %v31_v13, %v43_v21  ;;  %v300_v13 = vld [vmem:[%s899_s2 + $0x18] sm:$0xff] }
  0x7e   :  { %v586_v19 = vsel %vm45_vm3, 1.0, %v621_v15  ;;  %v588_v22 = vsel %vm47_vm5, 1.0, %v621_v15  ;;  %360 = vmatpush.msra.mxu1 %v300_v13  ;;  %607 = vmatpush.msra.mxu3 %v300_v13 }
  0x7f   :  { %591 = vmatmul.msk.f32.gmra.mxu0 %vm63_vm1, %v586_v19 }
  0x80   :  { %361 = vmatpush.msra.mxu1 %v299_v14  ;;  %608 = vmatpush.msra.mxu3 %v299_v14 }
  0x82   :  { %362 = vmatpush.msra.mxu1 %v298_v16  ;;  %609 = vmatpush.msra.mxu3 %v298_v16 }
  0x84   :  { %363 = vmatpush.msra.mxu1 %v297_v18  ;;  %610 = vmatpush.msra.mxu3 %v297_v18 }
  0x87   :  { %592 = vmatmul.msk.f32.gmra.mxu0 %vm63_vm1, %v587_v20 }
  0x8f   :  { %593 = vmatmul.msk.f32.gmra.mxu0 %vm63_vm1, %v588_v22 }
  0xf4   :  { %v97_v23 = vpop.f32.mrf.mxu0 }
  0xf5   :  { %v702_v24 = vrot.slane %v97_v23, 2  ;;  %v704_v25 = vrot.slane %v97_v23, 4  ;;  %v706_v26 = vrot.slane %v97_v23, 6  ;;  %123 = vst [vmem:[#allocation1] ss:$4 sm:$0xff] %v97_v23 }
  0xf7   :  { %125 = vst [vmem:[#allocation1 + $0x1] ss:$4 sm:$0xff] %v702_v24 }
  0xf8   :  { %127 = vst [vmem:[#allocation1 + $0x2] ss:$4 sm:$0xff] %v704_v25 }
  0xf9   :  { %129 = vst [vmem:[#allocation1 + $0x3] ss:$4 sm:$0xff] %v706_v26 }
  0xfc   :  { %v711_v27 = vpop.f32.mrf.mxu0 }
  0xfd   :  { %v714_v28 = vrot.slane %v711_v27, 2  ;;  %v118_v29 = vrot.slane %v711_v27, 6  ;;  %131 = vst [vmem:[#allocation1 + $0x20] ss:$4 sm:$0xff] %v711_v27  ;;  %v117_v46 = vrot.slane %v711_v27, 4 }
  0xff   :  { %133 = vst [vmem:[#allocation1 + $0x21] ss:$4 sm:$0xff] %v714_v28 }
 0x100   :  { %v719_v30 = vld.sshfl [vmem:[#allocation1] sm:$0xff pattern:$0x73625140] }
 0x101   :  { %136 = vst [vmem:[#allocation1] ss:$4 sm:$0xff] %v118_v29 }
 0x104   :  { %v721_v31 = vpop.f32.mrf.mxu0 }
 0x105   :  { %v724_v32 = vrot.slane %v721_v31, 2  ;;  %v727_v33 = vrot.slane %v721_v31, 4  ;;  %v730_v34 = vrot.slane %v721_v31, 6  ;;  %137 = vst [vmem:[#allocation1 + $0x1] ss:$4 sm:$0xff] %v721_v31 }
 0x106   :  { %v733_v35 = vld.sshfl [vmem:[#allocation1 + $0x20] sm:$0xff pattern:$0x73625140] }
 0x107   :  { %138 = vst [vmem:[#allocation1 + $0x2] ss:$4 sm:$0xff] %v724_v32 }
 0x108   :  { %139 = vst [vmem:[#allocation1 + $0x3] ss:$4 sm:$0xff] %v727_v33 }
 0x109   :  { %140 = vst [vmem:[#allocation1 + $0x20] ss:$4 sm:$0xff] %v730_v34 }
 0x10c   :  { %v738_v36 = vpop.f32.mrf.mxu0 }
 0x10d   :  { %141 = vst [vmem:[#allocation1 + $0x21] ss:$4 sm:$0xff] %v738_v36  ;;  %v122_v49 = vrot.slane %v738_v36, 2 }
 0x10f   :  { %v741_v37 = vld.sshfl [vmem:[#allocation1] sm:$0xff pattern:$0x73625140] }
 0x110   :  { %148 = vst [vmem:[#allocation1] ss:$4 sm:$0xff] %v97_v23 }
 0x111   :  { %150 = vst [vmem:[#allocation1 + $0x1] ss:$4 sm:$0xff] %v702_v24 }
 0x112   :  { %152 = vst [vmem:[#allocation1 + $0x2] ss:$4 sm:$0xff] %v704_v25 }
 0x113   :  { %154 = vst [vmem:[#allocation1 + $0x3] ss:$4 sm:$0xff] %v706_v26 }
 0x114   :  { %v746_v38 = vld.sshfl [vmem:[#allocation1 + $0x20] sm:$0xff pattern:$0x73625140] }
 0x115   :  { %156 = vst [vmem:[#allocation1 + $0x20] ss:$4 sm:$0xff] %v711_v27 }
 0x116   :  { %158 = vst [vmem:[#allocation1 + $0x21] ss:$4 sm:$0xff] %v714_v28 }
 0x11a   :  { %v159_v39 = vld.sshfl [vmem:[#allocation1] sm:$0xff pattern:$0x73625140] }
 0x11b   :  { %161 = vst [vmem:[#allocation1] ss:$4 sm:$0xff] %v118_v29  ;;  %v170_v42 = vrot.slane %v159_v39, 1 }
 0x11c   :  { %162 = vst [vmem:[#allocation1 + $0x1] ss:$4 sm:$0xff] %v721_v31 }
 0x11d   :  { %163 = vst [vmem:[#allocation1 + $0x2] ss:$4 sm:$0xff] %v724_v32  ;;  %v160_v40 = vld.sshfl [vmem:[#allocation1 + $0x20] sm:$0xff pattern:$0x73625140] }
 0x11e   :  { %164 = vst [vmem:[#allocation1 + $0x3] ss:$4 sm:$0xff] %v727_v33  ;;  %v171_v41 = vrot.slane %v160_v40, 1 }
 0x11f   :  { %165 = vst [vmem:[#allocation1 + $0x20] ss:$4 sm:$0xff] %v730_v34 }
 0x120   :  { %166 = vst [vmem:[#allocation1 + $0x21] ss:$4 sm:$0xff] %v738_v36  ;;  %178 = vrot.lane.b32.xlu1 %v171_v41, %s622_s0  ;;  %v172_v43 = vsel %vm169_vm6, %v170_v42, %v171_v41 }
 0x121   :  { %176 = vrot.lane.b32.xlu2 %v172_v43, %s622_s0 }
 0x125   :  { %v167_v44 = vld.sshfl [vmem:[#allocation1] sm:$0xff pattern:$0x73625140] }
 0x126   :  { %188 = vst [vmem:[#allocation1] ss:$4 sm:$0xff] %v702_v24  ;;  %v173_v51 = vrot.slane %v167_v44, 1 }
 0x127   :  { %190 = vst [vmem:[#allocation1 + $0x1] ss:$4 sm:$0xff] %v704_v25  ;;  %v168_v45 = vld.sshfl [vmem:[#allocation1 + $0x20] sm:$0xff pattern:$0x73625140] }
 0x128   :  { %192 = vst [vmem:[#allocation1 + $0x2] ss:$4 sm:$0xff] %v706_v26  ;;  %v174_v50 = vrot.slane %v168_v45, 1 }
 0x129   :  { %194 = vst [vmem:[#allocation1 + $0x3] ss:$4 sm:$0xff] %v711_v27 }
 0x12a   :  { %196 = vst [vmem:[#allocation1 + $0x20] ss:$4 sm:$0xff] %v714_v28  ;;  %v175_v52 = vsel %vm169_vm6, %v173_v51, %v174_v50 }
 0x12b   :  { %198 = vst [vmem:[#allocation1 + $0x21] ss:$4 sm:$0xff] %v117_v46 }
 0x130   :  { %v199_v47 = vld.sshfl [vmem:[#allocation1] sm:$0xff pattern:$0x73625140] }
 0x131   :  { %201 = vst [vmem:[#allocation1] ss:$4 sm:$0xff] %v721_v31  ;;  %209 = vrot.lane.b32.xlu2 %v199_v47, %s623_s1 }
 0x132   :  { %202 = vst [vmem:[#allocation1 + $0x1] ss:$4 sm:$0xff] %v724_v32  ;;  %v200_v48 = vld.sshfl [vmem:[#allocation1 + $0x20] sm:$0xff pattern:$0x73625140] }
 0x133   :  { %203 = vst [vmem:[#allocation1 + $0x2] ss:$4 sm:$0xff] %v727_v33  ;;  %211 = vrot.lane.b32.xlu0 %v200_v48, %s623_s1 }
 0x134   :  { %204 = vst [vmem:[#allocation1 + $0x3] ss:$4 sm:$0xff] %v730_v34 }
 0x135   :  { %205 = vst [vmem:[#allocation1 + $0x20] ss:$4 sm:$0xff] %v738_v36 }
 0x136   :  { %206 = vst [vmem:[#allocation1 + $0x21] ss:$4 sm:$0xff] %v122_v49 }
 0x139   :  { %180 = vrot.lane.b32.xlu2 %v175_v52, %s622_s0 }
 0x13b   :  { %v207_v53 = vld.sshfl [vmem:[#allocation1] sm:$0xff pattern:$0x73625140] }
 0x13c   :  { %221 = vst [vmem:[#allocation1] ss:$4 sm:$0xff] %v702_v24  ;;  %213 = vrot.lane.b32.xlu1 %v207_v53, %s623_s1 }
 0x13d   :  { %223 = vst [vmem:[#allocation1 + $0x1] ss:$4 sm:$0xff] %v704_v25  ;;  %v208_v54 = vld.sshfl [vmem:[#allocation1 + $0x20] sm:$0xff pattern:$0x73625140] }
 0x13e   :  { %225 = vst [vmem:[#allocation1 + $0x2] ss:$4 sm:$0xff] %v706_v26 }
 0x13f   :  { %227 = vst [vmem:[#allocation1 + $0x3] ss:$4 sm:$0xff] %v711_v27 }
 0x140   :  { %229 = vst [vmem:[#allocation1 + $0x20] ss:$4 sm:$0xff] %v714_v28 }
 0x141   :  { %231 = vst [vmem:[#allocation1 + $0x21] ss:$4 sm:$0xff] %v117_v46 }
 0x144   :  { %182 = vrot.lane.b32.xlu1 %v174_v50, %s622_s0 }
 0x146   :  { %v232_v55 = vld.sshfl [vmem:[#allocation1] sm:$0xff pattern:$0x73625140] }
 0x147   :  { %234 = vst [vmem:[#allocation1] ss:$4 sm:$0xff] %v721_v31  ;;  %v242_v58 = vrot.slane %v232_v55, 1 }
 0x148   :  { %235 = vst [vmem:[#allocation1 + $0x1] ss:$4 sm:$0xff] %v724_v32  ;;  %v233_v56 = vld.sshfl [vmem:[#allocation1 + $0x20] sm:$0xff pattern:$0x73625140] }
 0x149   :  { %236 = vst [vmem:[#allocation1 + $0x2] ss:$4 sm:$0xff] %v727_v33  ;;  %v243_v57 = vrot.slane %v233_v56, 1 }
 0x14a   :  { %237 = vst [vmem:[#allocation1 + $0x3] ss:$4 sm:$0xff] %v730_v34 }
 0x14b   :  { %238 = vst [vmem:[#allocation1 + $0x20] ss:$4 sm:$0xff] %v738_v36  ;;  %250 = vrot.lane.b32.xlu2 %v243_v57, %s624_s23  ;;  %v244_v59 = vsel %vm169_vm6, %v242_v58, %v243_v57 }
 0x14c   :  { %239 = vst [vmem:[#allocation1 + $0x21] ss:$4 sm:$0xff] %v122_v49  ;;  %248 = vrot.lane.b32.xlu0 %v244_v59, %s624_s23 }
 0x151   :  { %v240_v60 = vld.sshfl [vmem:[#allocation1] sm:$0xff pattern:$0x73625140] }
 0x152   :  { %v245_v62 = vrot.slane %v240_v60, 1 }
 0x153   :  { %v241_v61 = vld.sshfl [vmem:[#allocation1 + $0x20] sm:$0xff pattern:$0x73625140]  ;;  %215 = vrot.lane.b32.xlu2 %v208_v54, %s623_s1 }
 0x154   :  { %v246_v63 = vrot.slane %v241_v61, 1 }
 0x156   :  { %v247_v0 = vsel %vm169_vm6, %v245_v62, %v246_v63  ;;  %v856_v62 = vld [vmem:[%s902_s4] sm:$0xff] }
 0x157   :  { %252 = vrot.lane.b32.xlu0 %v247_v0, %s624_s23  ;;  %v420_v0 = vrot.slane %v856_v62, 2  ;;  %v421_v1 = vrot.slane %v856_v62, 3  ;;  %v422_v3 = vrot.slane %v856_v62, 4  ;;  %v423_v4 = vrot.slane %v856_v62, 5 }
 0x158   :  { %v424_v5 = vrot.slane %v856_v62, 6  ;;  %v425_v13 = vrot.slane %v856_v62, 7 }
 0x15f   :  { %254 = vrot.lane.b32.xlu0 %v246_v63, %s624_s23  ;;  %v419_v63 = vrot.slane %v856_v62, 1 }
 0x17b   :  { %v177_v15 = vpop.permute.xlu2 %176 }
 0x17c   :  { %v261_v20 = vsel %vm260_vm7, %v719_v30, %v177_v15 }
 0x18b   :  { %v210_v19 = vpop.permute.xlu2 %209 }
 0x18c   :  { %v266_v21 = vsel %vm265_vm8, %v261_v20, %v210_v19 }
 0x192   :  { %v179_v27 = vpop.permute.xlu1 %178 }
 0x193   :  { %v181_v31 = vpop.permute.xlu2 %180  ;;  %v262_v30 = vsel %vm260_vm7, %v733_v35, %v179_v27 }
 0x194   :  { %v263_v40 = vsel %vm260_vm7, %v741_v37, %v181_v31 }
 0x1a5   :  { %v212_v17 = vpop.permute.xlu0 %211  ;;  %v251_v41 = vpop.permute.xlu2 %250 }
 0x1a6   :  { %v267_v34 = vsel %vm265_vm8, %v262_v30, %v212_v17 }
 0x1a7   :  { %v272_v42 = vsel %vm270_vm9, %v267_v34, %v251_v41 }
 0x1a8   :  { %v286_v45 = vrot.slane %v272_v42, 1  ;;  %v287_v47 = vrot.slane %v272_v42, 2 }
 0x1ad   :  { %v216_v53 = vpop.permute.xlu2 %215 }
 0x1ae   :  { %v214_v36 = vpop.permute.xlu1 %213 }
 0x1af   :  { %v268_v43 = vsel %vm265_vm8, %v263_v40, %v214_v36 }
 0x1b6   :  { %v183_v37 = vpop.permute.xlu1 %182 }
 0x1b7   :  { %v264_v51 = vsel %vm260_vm7, %v746_v38, %v183_v37 }
 0x1b8   :  { %v269_v54 = vsel %vm265_vm8, %v264_v51, %v216_v53 }
 0x1be   :  { %v249_v22 = vpop.permute.xlu0 %248 }
 0x1bf   :  { %v271_v23 = vsel %vm270_vm9, %v266_v21, %v249_v22  ;;  %v548_v21 = vld [vmem:[%s903_s5 + $0x10] sm:$0xff]  ;;  %v547_v22 = vld [vmem:[%s903_s5 + $0x8] sm:$0xff] }
 0x1c0   :  { %v279_v24 = vrot.slane %v271_v23, 1  ;;  %v280_v25 = vrot.slane %v271_v23, 2  ;;  %v281_v26 = vrot.slane %v271_v23, 3  ;;  %313 = vst [vmem:[#allocation1] ss:$9 sm:$0xff] %v271_v23  ;;  %v282_v28 = vrot.slane %v271_v23, 4  ;;  %573 = vmatpush.msra.mxu2 %v548_v21 }
 0x1c1   :  { %v283_v29 = vrot.slane %v271_v23, 5  ;;  %v284_v32 = vrot.slane %v271_v23, 6  ;;  %v285_v33 = vrot.slane %v271_v23, 7  ;;  %v619_v21 = vld [vmem:[%s901_s6] ss:$0 sm:$0xff] }
 0x1c2   :  { %315 = vst [vmem:[#allocation1 + $0x1] ss:$9 sm:$0xff] %v279_v24  ;;  %v546_v24 = vld [vmem:[%s903_s5] sm:$0xff]  ;;  %574 = vmatpush.msra.mxu2 %v547_v22 }
 0x1c3   :  { %317 = vst [vmem:[#allocation1 + $0x2] ss:$9 sm:$0xff] %v280_v25  ;;  %v416_v25 = vld [vmem:[%s902_s4 + $0x8] sm:$0x7] }
 0x1c4   :  { %319 = vst [vmem:[#allocation1 + $0x3] ss:$9 sm:$0xff] %v281_v26  ;;  %575 = vmatpush.msra.mxu2 %v546_v24  ;;  %v426_v27 = vrot.slane %v416_v25, 1 }
 0x1c5   :  { %321 = vst [vmem:[#allocation1 + $0x4] ss:$9 sm:$0xff] %v282_v28  ;;  %v427_v28 = vrot.slane %v416_v25, 2 }
 0x1c6   :  { %323 = vst [vmem:[#allocation1 + $0x5] ss:$9 sm:$0xff] %v283_v29 }
 0x1c7   :  { %325 = vst [vmem:[#allocation1 + $0x6] ss:$9 sm:$0xff] %v284_v32 }
 0x1c8   :  { %327 = vst [vmem:[#allocation1 + $0x7] ss:$9 sm:$0xff] %v285_v33 }
 0x1c9   :  { %v253_v39 = vpop.permute.xlu0 %252 }
 0x1ca   :  { %v273_v44 = vsel %vm270_vm9, %v268_v43, %v253_v39 }
 0x1cb   :  { %v288_v35 = vrot.slane %v273_v44, 1  ;;  %v289_v48 = vrot.slane %v273_v44, 2  ;;  %v290_v49 = vrot.slane %v273_v44, 3  ;;  %v291_v50 = vrot.slane %v273_v44, 4 }
 0x1cc   :  { %v292_v56 = vrot.slane %v273_v44, 5  ;;  %v293_v57 = vrot.slane %v273_v44, 6  ;;  %v294_v59 = vrot.slane %v273_v44, 7 }
 0x1cf   :  { %v328_v46 = vld [vmem:[#allocation1] sm:$0xff] }
 0x1d0   :  { %329 = vst [vmem:[#allocation1] ss:$9 sm:$0xff] %v272_v42  ;;  %364 = vmatmul.f32.vlgmr.msra.gmra.mxu1 %v328_v46 }
 0x1d1   :  { %330 = vst [vmem:[#allocation1 + $0x1] ss:$9 sm:$0xff] %v286_v45  ;;  %v255_v52 = vpop.permute.xlu0 %254 }
 0x1d2   :  { %331 = vst [vmem:[#allocation1 + $0x2] ss:$9 sm:$0xff] %v287_v47  ;;  %v274_v55 = vsel %vm270_vm9, %v269_v54, %v255_v52 }
 0x1d3   :  { %332 = vst [vmem:[#allocation1 + $0x3] ss:$9 sm:$0xff] %v273_v44  ;;  %v295_v60 = vrot.slane %v274_v55, 1  ;;  %v296_v61 = vrot.slane %v274_v55, 2 }
 0x1d4   :  { %333 = vst [vmem:[#allocation1 + $0x4] ss:$9 sm:$0xff] %v288_v35 }
 0x1d5   :  { %334 = vst [vmem:[#allocation1 + $0x5] ss:$9 sm:$0xff] %v289_v48 }
 0x1d6   :  { %335 = vst [vmem:[#allocation1 + $0x6] ss:$9 sm:$0xff] %v290_v49 }
 0x1d7   :  { %336 = vst [vmem:[#allocation1 + $0x7] ss:$9 sm:$0xff] %v291_v50 }
 0x1de   :  { %v337_v58 = vld [vmem:[#allocation1] sm:$0xff] }
 0x1df   :  { %338 = vst [vmem:[#allocation1] ss:$9 sm:$0xff] %v292_v56  ;;  %367 = vmatmul.f32.vlgmr.msra.gmra.mxu3 %v337_v58 }
 0x1e0   :  { %339 = vst [vmem:[#allocation1 + $0x1] ss:$9 sm:$0xff] %v293_v57 }
 0x1e1   :  { %340 = vst [vmem:[#allocation1 + $0x2] ss:$9 sm:$0xff] %v294_v59 }
 0x1e2   :  { %341 = vst [vmem:[#allocation1 + $0x3] ss:$9 sm:$0xff] %v274_v55 }
 0x1e3   :  { %342 = vst [vmem:[#allocation1 + $0x4] ss:$9 sm:$0xff] %v295_v60 }
 0x1e4   :  { %343 = vst [vmem:[#allocation1 + $0x5] ss:$9 sm:$0xff] %v296_v61 }
 0x1eb   :  { %v344_v38 = vld [vmem:[#allocation1] sm:$0xff] }
 0x1ec   :  { %370 = vmatmul.f32.gmra.mxu3 %v344_v38 }
 0x24d   :  { %v365_v2 = vpop.f32.mrf.mxu1 }
 0x24e   :  { %v377_v6 = vrot.slane %v365_v2, 1  ;;  %v378_v7 = vrot.slane %v365_v2, 2  ;;  %v379_v8 = vrot.slane %v365_v2, 3  ;;  %v380_v9 = vrot.slane %v365_v2, 4 }
 0x24f   :  { %v382_v10 = vrot.slane %v365_v2, 6  ;;  %v437_v11 = vadd.f32 %v856_v62, %v365_v2  ;;  %v381_v12 = vrot.slane %v365_v2, 5  ;;  %v383_v14 = vrot.slane %v365_v2, 7 }
 0x250   :  { %v438_v15 = vadd.f32 %v419_v63, %v377_v6  ;;  %v439_v16 = vadd.f32 %v420_v0, %v378_v7  ;;  %v440_v17 = vadd.f32 %v421_v1, %v379_v8  ;;  %v441_v18 = vadd.f32 %v422_v3, %v380_v9 }
 0x251   :  { %481 = vst [vmem:[#allocation1] ss:$9 sm:$0xff] %v437_v11  ;;  %v442_v19 = vadd.f32 %v423_v4, %v381_v12  ;;  %v443_v20 = vadd.f32 %v424_v5, %v382_v10  ;;  %v444_v23 = vadd.f32 %v425_v13, %v383_v14 }
 0x252   :  { %483 = vst [vmem:[#allocation1 + $0x1] ss:$9 sm:$0xff] %v438_v15 }
 0x253   :  { %485 = vst [vmem:[#allocation1 + $0x2] ss:$9 sm:$0xff] %v439_v16 }
 0x254   :  { %487 = vst [vmem:[#allocation1 + $0x3] ss:$9 sm:$0xff] %v440_v17 }
 0x255   :  { %489 = vst [vmem:[#allocation1 + $0x4] ss:$9 sm:$0xff] %v441_v18 }
 0x256   :  { %491 = vst [vmem:[#allocation1 + $0x5] ss:$9 sm:$0xff] %v442_v19 }
 0x257   :  { %493 = vst [vmem:[#allocation1 + $0x6] ss:$9 sm:$0xff] %v443_v20 }
 0x258   :  { %495 = vst [vmem:[#allocation1 + $0x7] ss:$9 sm:$0xff] %v444_v23 }
 0x25f   :  { %v496_v33 = vld [vmem:[#allocation1] sm:$0xff] }
 0x260   :  { %v519_v57 = vsel %vm518_vm11, %v496_v33, -inf }
 0x262   :  { %v368_v26 = vpop.f32.mrf.mxu3 }
 0x263   :  { %v384_v29 = vrot.slane %v368_v26, 1  ;;  %v385_v31 = vrot.slane %v368_v26, 2  ;;  %v445_v32 = vadd.f32 %v416_v25, %v368_v26  ;;  %v386_v36 = vrot.slane %v368_v26, 3 }
 0x264   :  { %v387_v39 = vrot.slane %v368_v26, 4  ;;  %v388_v40 = vrot.slane %v368_v26, 5  ;;  %v389_v41 = vrot.slane %v368_v26, 6  ;;  %v390_v42 = vrot.slane %v368_v26, 7 }
 0x265   :  { %v446_v30 = vadd.f32 %v426_v27, %v384_v29  ;;  %v447_v34 = vadd.f32 %v427_v28, %v385_v31  ;;  %497 = vst [vmem:[#allocation1] ss:$9 sm:$0xff] %v445_v32  ;;  %v448_v43 = vadd.f32 %v856_v62, %v386_v36 }
 0x266   :  { %v449_v45 = vadd.f32 %v419_v63, %v387_v39  ;;  %v450_v48 = vadd.f32 %v420_v0, %v388_v40  ;;  %v451_v49 = vadd.f32 %v421_v1, %v389_v41  ;;  %v452_v50 = vadd.f32 %v422_v3, %v390_v42 }
 0x267   :  { %498 = vst [vmem:[#allocation1 + $0x1] ss:$9 sm:$0xff] %v446_v30 }
 0x268   :  { %499 = vst [vmem:[#allocation1 + $0x2] ss:$9 sm:$0xff] %v447_v34 }
 0x26f   :  { %v371_v44 = vpop.f32.mrf.mxu3  ;;  %v500_v35 = vld [vmem:[#allocation1] sm:$0xff] }
 0x270   :  { %v391_v46 = vrot.slane %v371_v44, 1  ;;  %v392_v47 = vrot.slane %v371_v44, 2  ;;  %501 = vst [vmem:[#allocation1] ss:$9 sm:$0xff] %v448_v43  ;;  %v453_v51 = vadd.f32 %v423_v4, %v371_v44  ;;  %v393_v53 = vrot.slane %v371_v44, 3 }
 0x271   :  { %502 = vst [vmem:[#allocation1 + $0x1] ss:$9 sm:$0xff] %v449_v45  ;;  %v521_v54 = vsel %vm520_vm10, %v500_v35, -inf  ;;  %v394_v55 = vrot.slane %v371_v44, 4  ;;  %v395_v56 = vrot.slane %v371_v44, 5 }
 0x272   :  { %v454_v37 = vadd.f32 %v424_v5, %v391_v46  ;;  %503 = vst [vmem:[#allocation1 + $0x2] ss:$9 sm:$0xff] %v450_v48  ;;  %v455_v52 = vadd.f32 %v425_v13, %v392_v47  ;;  %v522_v58 = vmax.f32 %v519_v57, %v521_v54  ;;  %v456_v59 = vadd.f32 %v416_v25, %v393_v53  ;;  %v618_v13 = vld [vmem:[%s900_s3] ss:$0 sm:$0xff] }
 0x273   :  { %504 = vst [vmem:[#allocation1 + $0x3] ss:$9 sm:$0xff] %v451_v49  ;;  %v457_v60 = vadd.f32 %v426_v27, %v394_v55  ;;  %v458_v38 = vadd.f32 %v427_v28, %v395_v56 }
 0x274   :  { %505 = vst [vmem:[#allocation1 + $0x4] ss:$9 sm:$0xff] %v452_v50  ;;  %v523_v62 = vrot.slane %v522_v58, 4 }
 0x275   :  { %506 = vst [vmem:[#allocation1 + $0x5] ss:$9 sm:$0xff] %v453_v51 }
 0x276   :  { %507 = vst [vmem:[#allocation1 + $0x6] ss:$9 sm:$0xff] %v454_v37  ;;  %v524_v63 = vmax.f32 %v522_v58, %v523_v62 }
 0x277   :  { %508 = vst [vmem:[#allocation1 + $0x7] ss:$9 sm:$0xff] %v455_v52 }
 0x278   :  { %v525_v1 = vrot.slane %v524_v63, 2 }
 0x27a   :  { %v526_v5 = vmax.f32 %v524_v63, %v525_v1 }
 0x27c   :  { %v527_v8 = vrot.slane %v526_v5, 1 }
 0x27e   :  { %v509_v61 = vld [vmem:[#allocation1] sm:$0xff]  ;;  %v528_v11 = vmax.f32 %v526_v5, %v527_v8 }
 0x27f   :  { %510 = vst [vmem:[#allocation1] ss:$9 sm:$0xff] %v456_v59  ;;  %v529_v2 = vsel %vm518_vm11, %v509_v61, -inf }
 0x280   :  { %511 = vst [vmem:[#allocation1 + $0x1] ss:$9 sm:$0xff] %v457_v60  ;;  %v542_v15 = vadd.f32 %v618_v13, %v528_v11 }
 0x281   :  { %512 = vst [vmem:[#allocation1 + $0x2] ss:$9 sm:$0xff] %v458_v38 }
 0x282   :  { %v544_v18 = vmax.f32 %v542_v15, 0.0 }
 0x288   :  { %v513_v0 = vld [vmem:[#allocation1] sm:$0xff] }
 0x289   :  { %v530_v3 = vsel %vm520_vm10, %v513_v0, -inf }
 0x28a   :  { %v531_v4 = vmax.f32 %v529_v2, %v530_v3 }
 0x28c   :  { %v532_v6 = vrot.slane %v531_v4, 4 }
 0x28e   :  { %v533_v7 = vmax.f32 %v531_v4, %v532_v6 }
 0x290   :  { %v534_v9 = vrot.slane %v533_v7, 2 }
 0x292   :  { %v535_v10 = vmax.f32 %v533_v7, %v534_v9 }
 0x294   :  { %v536_v12 = vrot.slane %v535_v10, 1 }
 0x296   :  { %v537_v14 = vmax.f32 %v535_v10, %v536_v12 }
 0x298   :  { %v543_v16 = vadd.f32 %v618_v13, %v537_v14 }
 0x29a   :  { %v545_v17 = vmax.f32 %v543_v16, 0.0 }
 0x29c   :  { %v555_v19 = vrot.slane %v545_v17, 7 }
 0x29e   :  { %v557_v20 = vsel %vm556_vm12, %v555_v19, %v544_v18 }
 0x29f   :  { %594 = vmatmul.msk.f32.vlgmr.msra.gmra.mxu2 %vm518_vm11, %v557_v20 }
 0x322   :  { %v577_v22 = vpop.f32.mrf.mxu2 }
 0x323   :  { %v578_v23 = vadd.f32 %v619_v21, %v577_v22 }
 0x325   :  { %580 = vst [vmem:[%s904_s7] sm:$0x3] %v578_v23 }

</bundles_post_ra>
